<compile_context>
chip_gen: v7x
topology: tpu7x:2x2x1
jax: 0.10.0
libtpu: 0.0.40
codegen_flags: <defaults>
</compile_context>

<pallas_src>
import functools
import math
from numbers import Number

import jax
import jax.numpy as jnp
from jax.experimental import pallas as pl
from jax.experimental.pallas import tpu as pltpu

_LANE = 128
_SUBLANE = 8


def _round_up(x, m):
    return ((x + m - 1) // m) * m


def _act(name, slope):
    if name == "lrelu":
        return lambda h: jnp.where(h >= 0, h, slope * h)
    elif name == "xtanh":
        return lambda h: jnp.tanh(h) + slope * h
    elif name == "sigmoid":
        return lambda h: jax.nn.sigmoid(h)
    elif name == "none":
        return lambda h: h
    else:
        raise ValueError(f"Incorrect activation: {name}")


def _mlp_kernel(x_ref, *refs, n_layers, activations, slope, out_pads):
    """refs = (w0, ..., w_{L-1}, bias_stack_ref, out_ref).

    x tile: (TILE_B, in_pad) fp32.  Weights: (din_pad, dout_pad) bf16 (MXU input
    dtype).  Bias stack: (n_layers, max_out_pad) fp32.  Hidden state h stays
    fp32; only the jnp.dot operands are bf16, accumulation is fp32.
    """
    w_refs = refs[:n_layers]
    b_ref = refs[n_layers]
    o_ref = refs[n_layers + 1]

    h = x_ref[...].astype(jnp.float32)
    for c in range(n_layers):
        w = w_refs[c][...]                       # bf16 tile, MXU fast path
        dout = out_pads[c]
        b = b_ref[c:c + 1, :dout]                # (1, dout_pad) fp32, broadcasts
        h = jnp.dot(h.astype(w.dtype), w, preferred_element_type=jnp.float32) + b
        if c != n_layers - 1:
            h = _act(activations[c], slope)(h)   # fp32 VPU/EUP math
    o_ref[...] = h.astype(o_ref.dtype)           # lane-dense (dout_pad >= 128) store


class MLPPallas:
    """JAX/Pallas re-implementation of the PyTorch MLP module's forward."""

    def __init__(self, input_dim, output_dim, hidden_dim, n_layers,
                 activation="none", slope=0.1, key=None):
        self.input_dim = input_dim
        self.output_dim = output_dim
        self.n_layers = n_layers
        self.slope = float(slope)

        if isinstance(hidden_dim, Number):
            self.hidden_dim = [hidden_dim] * (n_layers - 1)
        elif isinstance(hidden_dim, list):
            self.hidden_dim = hidden_dim
        else:
            raise ValueError(f"Wrong argument type for hidden_dim: {hidden_dim}")

        if isinstance(activation, str):
            self.activation = [activation] * (n_layers - 1)
        elif isinstance(activation, list):
            self.activation = activation
        else:
            raise ValueError(f"Wrong argument type for activation: {activation}")

        if key is None:
            key = jax.random.PRNGKey(0)

        if n_layers == 1:
            dims = [(input_dim, output_dim)]
        else:
            dims = [(input_dim, self.hidden_dim[0])]
            for i in range(1, n_layers - 1):
                dims.append((self.hidden_dim[i - 1], self.hidden_dim[i]))
            dims.append((self.hidden_dim[n_layers - 2], output_dim))
        self.dims = dims

        # Parameter init (uniform like nn.Linear's default range).  Weights are
        # quantized to bf16 (what the kernel feeds the MXU); biases stay fp32.
        self.w_bf16 = []   # unpadded, used by the reference too
        self.b_f32 = []
        for (din, dout) in dims:
            key, kw, kb = jax.random.split(key, 3)
            bound = 1.0 / math.sqrt(din)
            w = jax.random.uniform(kw, (din, dout), jnp.float32, -bound, bound)
            b = jax.random.uniform(kb, (dout,), jnp.float32, -bound, bound)
            self.w_bf16.append(w.astype(jnp.bfloat16))
            self.b_f32.append(b)

        # Lane-dense padding of every feature dim to a multiple of 128.
        self.in_pad = _round_up(input_dim, _LANE)
        self.out_pads = [_round_up(dout, _LANE) for (_, dout) in dims]
        self.din_pads = [self.in_pad] + self.out_pads[:-1]

        self.w_padded = []
        for c, (din, dout) in enumerate(dims):
            wp = jnp.zeros((self.din_pads[c], self.out_pads[c]), jnp.bfloat16)
            wp = wp.at[:din, :dout].set(self.w_bf16[c])
            self.w_padded.append(wp)

        max_out = max(self.out_pads)
        bias_stack = jnp.zeros((n_layers, max_out), jnp.float32)
        for c, (_, dout) in enumerate(dims):
            bias_stack = bias_stack.at[c, :dout].set(self.b_f32[c])
        self.bias_stack = bias_stack

    def __call__(self, x):
        batch = x.shape[0]
        tile_b = min(128, _round_up(batch, _SUBLANE))
        batch_pad = _round_up(batch, tile_b)
        n_tiles = batch_pad // tile_b
        out_pad = self.out_pads[-1]

        # Zero-pad batch (to the tile) and the input feature dim (to 128 lanes).
        xp = jnp.zeros((batch_pad, self.in_pad), jnp.float32)
        xp = xp.at[:batch, :self.input_dim].set(x.astype(jnp.float32))

        kernel = functools.partial(
            _mlp_kernel,
            n_layers=self.n_layers,
            activations=tuple(self.activation),
            slope=self.slope,
            out_pads=tuple(self.out_pads),
        )

        flops = 2 * batch_pad * sum(dp * op for dp, op in zip(self.din_pads, self.out_pads))
        transcendentals = batch_pad * sum(
            op for a, op in zip(self.activation, self.out_pads[:-1])
            if a in ("xtanh", "sigmoid"))
        bytes_accessed = (xp.size * 4
                          + sum(w.size * 2 for w in self.w_padded)
                          + self.bias_stack.size * 4
                          + batch_pad * out_pad * 4)

        in_specs = (
            [pl.BlockSpec((tile_b, self.in_pad), lambda i: (i, 0))]
            + [pl.BlockSpec(w.shape, lambda i: (0, 0)) for w in self.w_padded]
            + [pl.BlockSpec(self.bias_stack.shape, lambda i: (0, 0))]
        )

        out = pl.pallas_call(
            kernel,
            out_shape=jax.ShapeDtypeStruct((batch_pad, out_pad), jnp.float32),
            grid=(n_tiles,),
            in_specs=in_specs,
            out_specs=pl.BlockSpec((tile_b, out_pad), lambda i: (i, 0)),
            compiler_params=pltpu.CompilerParams(
                dimension_semantics=("parallel",)),
            cost_estimate=pl.CostEstimate(
                flops=flops,
                transcendentals=transcendentals,
                bytes_accessed=bytes_accessed),
        )(xp, *self.w_padded, self.bias_stack)

        return out[:batch, :self.output_dim]

    def reference(self, x):
        """Pure-JAX reference (same bf16 weight/input quantization as the kernel)."""
        h = x.astype(jnp.float32)
        for c in range(self.n_layers):
            w = self.w_bf16[c].astype(jnp.float32)
            b = self.b_f32[c]
            h = jnp.dot(h.astype(jnp.bfloat16).astype(jnp.float32), w) + b
            if c != self.n_layers - 1:
                h = _act(self.activation[c], self.slope)(h)
        return h


if __name__ == "__main__":
    key = jax.random.PRNGKey(0)
    kx, kp1, kp2 = jax.random.split(key, 3)

    # Config 1: 3-layer MLP with lrelu hidden activations.
    batch, input_dim, hidden_dim, output_dim, n_layers = 16, 16, 32, 8, 3
    x = jax.random.normal(kx, (batch, input_dim), jnp.float32)
    mlp = MLPPallas(input_dim, output_dim, hidden_dim, n_layers,
                    activation="lrelu", slope=0.1, key=kp1)
    out = jax.block_until_ready(mlp(x))
    ref = mlp.reference(x)
    assert out.shape == (batch, output_dim)
    assert jnp.allclose(out, ref, atol=1e-3, rtol=1e-3), \
        float(jnp.max(jnp.abs(out - ref)))

    # Config 2: 2-layer MLP with xtanh (exercises the EUP/transcendental path).
    mlp2 = MLPPallas(input_dim, output_dim, hidden_dim, 2,
                     activation="xtanh", slope=0.1, key=kp2)
    out2 = jax.block_until_ready(mlp2(x))
    ref2 = mlp2.reference(x)
    assert out2.shape == (batch, output_dim)
    assert jnp.allclose(out2, ref2, atol=1e-3, rtol=1e-3), \
        float(jnp.max(jnp.abs(out2 - ref2)))

    print("KERNEL_OK")
</pallas_src>

<mosaic_0001>
module attributes {stable_mosaic.version = 11 : i64} {
  func.func @_mlp_kernel(%arg0: i32, %arg1: memref<16x128xf32, #tpu.memory_space<vmem>>, %arg2: memref<128x128xbf16, #tpu.memory_space<vmem>>, %arg3: memref<128x128xbf16, #tpu.memory_space<vmem>>, %arg4: memref<128x128xbf16, #tpu.memory_space<vmem>>, %arg5: memref<3x128xf32, #tpu.memory_space<vmem>>, %arg6: memref<16x128xf32, #tpu.memory_space<vmem>>) attributes {dimension_semantics = [#tpu.dimension_semantics<parallel>], iteration_bounds = array<i64: 1>, scalar_prefetch = 0 : i64, scratch_operands = 0 : i64, tpu.core_type = #tpu.core_type<tc>, window_params = [{transform_indices = @transform_0, window_bounds = array<i64: 16, 128>}, {pipeline_mode = #tpu.pipeline_mode<synchronous>, transform_indices = @transform_1, window_bounds = array<i64: 128, 128>}, {pipeline_mode = #tpu.pipeline_mode<synchronous>, transform_indices = @transform_2, window_bounds = array<i64: 128, 128>}, {pipeline_mode = #tpu.pipeline_mode<synchronous>, transform_indices = @transform_3, window_bounds = array<i64: 128, 128>}, {pipeline_mode = #tpu.pipeline_mode<synchronous>, transform_indices = @transform_4, window_bounds = array<i64: 3, 128>}, {transform_indices = @transform_5, window_bounds = array<i64: 16, 128>}]} {
    %c0 = arith.constant 0 : index
    %c0_0 = arith.constant 0 : index
    %0 = vector.load %arg1[%c0, %c0_0] : memref<16x128xf32, #tpu.memory_space<vmem>>, vector<16x128xf32>
    %c0_1 = arith.constant 0 : index
    %c0_2 = arith.constant 0 : index
    %1 = vector.load %arg2[%c0_1, %c0_2] : memref<128x128xbf16, #tpu.memory_space<vmem>>, vector<128x128xbf16>
    %c0_3 = arith.constant 0 : index
    %c0_4 = arith.constant 0 : index
    %2 = vector.load %arg5[%c0_3, %c0_4] : memref<3x128xf32, #tpu.memory_space<vmem>>, vector<1x128xf32>
    %3 = arith.truncf %0 : vector<16x128xf32> to vector<16x128xbf16>
    %cst = arith.constant dense<0.000000e+00> : vector<16x128xf32>
    %4 = tpu.matmul %3, %1, %cst {dimension_numbers = #tpu.dot_dimension_numbers<[1], [0], [0], [1], [0, 0, 1, 1], [], []>} : vector<16x128xbf16>, vector<128x128xbf16>, vector<16x128xf32> -> vector<16x128xf32>
    %5 = vector.broadcast %2 : vector<1x128xf32> to vector<16x128xf32>
    %6 = arith.addf %4, %5 : vector<16x128xf32>
    %cst_5 = arith.constant 0.000000e+00 : f32
    %7 = vector.broadcast %cst_5 : f32 to vector<16x128xf32>
    %8 = arith.cmpf oge, %6, %7 : vector<16x128xf32>
    %cst_6 = arith.constant 1.000000e-01 : f32
    %9 = vector.broadcast %cst_6 : f32 to vector<16x128xf32>
    %10 = arith.mulf %9, %6 : vector<16x128xf32>
    %11 = arith.select %8, %6, %10 : vector<16x128xi1>, vector<16x128xf32>
    %c0_7 = arith.constant 0 : index
    %c0_8 = arith.constant 0 : index
    %12 = vector.load %arg3[%c0_7, %c0_8] : memref<128x128xbf16, #tpu.memory_space<vmem>>, vector<128x128xbf16>
    %c1 = arith.constant 1 : index
    %c0_9 = arith.constant 0 : index
    %13 = vector.load %arg5[%c1, %c0_9] : memref<3x128xf32, #tpu.memory_space<vmem>>, vector<1x128xf32>
    %14 = arith.truncf %11 : vector<16x128xf32> to vector<16x128xbf16>
    %cst_10 = arith.constant dense<0.000000e+00> : vector<16x128xf32>
    %15 = tpu.matmul %14, %12, %cst_10 {dimension_numbers = #tpu.dot_dimension_numbers<[1], [0], [0], [1], [0, 0, 1, 1], [], []>} : vector<16x128xbf16>, vector<128x128xbf16>, vector<16x128xf32> -> vector<16x128xf32>
    %16 = vector.broadcast %13 : vector<1x128xf32> to vector<16x128xf32>
    %17 = arith.addf %15, %16 : vector<16x128xf32>
    %cst_11 = arith.constant 0.000000e+00 : f32
    %18 = vector.broadcast %cst_11 : f32 to vector<16x128xf32>
    %19 = arith.cmpf oge, %17, %18 : vector<16x128xf32>
    %cst_12 = arith.constant 1.000000e-01 : f32
    %20 = vector.broadcast %cst_12 : f32 to vector<16x128xf32>
    %21 = arith.mulf %20, %17 : vector<16x128xf32>
    %22 = arith.select %19, %17, %21 : vector<16x128xi1>, vector<16x128xf32>
    %c0_13 = arith.constant 0 : index
    %c0_14 = arith.constant 0 : index
    %23 = vector.load %arg4[%c0_13, %c0_14] : memref<128x128xbf16, #tpu.memory_space<vmem>>, vector<128x128xbf16>
    %c2 = arith.constant 2 : index
    %c0_15 = arith.constant 0 : index
    %24 = vector.load %arg5[%c2, %c0_15] : memref<3x128xf32, #tpu.memory_space<vmem>>, vector<1x128xf32>
    %25 = arith.truncf %22 : vector<16x128xf32> to vector<16x128xbf16>
    %cst_16 = arith.constant dense<0.000000e+00> : vector<16x128xf32>
    %26 = tpu.matmul %25, %23, %cst_16 {dimension_numbers = #tpu.dot_dimension_numbers<[1], [0], [0], [1], [0, 0, 1, 1], [], []>} : vector<16x128xbf16>, vector<128x128xbf16>, vector<16x128xf32> -> vector<16x128xf32>
    %27 = vector.broadcast %24 : vector<1x128xf32> to vector<16x128xf32>
    %28 = arith.addf %26, %27 : vector<16x128xf32>
    %c0_17 = arith.constant 0 : index
    %c0_18 = arith.constant 0 : index
    %29 = vector.load %arg6[%c0_17, %c0_18] : memref<16x128xf32, #tpu.memory_space<vmem>>, vector<16x128xf32>
    tpu.vector_store %arg6[%c0_17, %c0_18], %28 {strides = array<i32>} : memref<16x128xf32, #tpu.memory_space<vmem>>, vector<16x128xf32>,
    return
  }
  func.func @transform_0(%arg0: i32) -> (i32, i32) {
    %c0_i32 = arith.constant 0 : i32
    %c0_i32_0 = arith.constant 0 : i32
    return %arg0, %c0_i32 : i32, i32
  }
  func.func @transform_1(%arg0: i32) -> (i32, i32) {
    %c0_i32 = arith.constant 0 : i32
    %c0_i32_0 = arith.constant 0 : i32
    %c0_i32_1 = arith.constant 0 : i32
    return %c0_i32, %c0_i32_0 : i32, i32
  }
  func.func @transform_2(%arg0: i32) -> (i32, i32) {
    %c0_i32 = arith.constant 0 : i32
    %c0_i32_0 = arith.constant 0 : i32
    %c0_i32_1 = arith.constant 0 : i32
    return %c0_i32, %c0_i32_0 : i32, i32
  }
  func.func @transform_3(%arg0: i32) -> (i32, i32) {
    %c0_i32 = arith.constant 0 : i32
    %c0_i32_0 = arith.constant 0 : i32
    %c0_i32_1 = arith.constant 0 : i32
    return %c0_i32, %c0_i32_0 : i32, i32
  }
  func.func @transform_4(%arg0: i32) -> (i32, i32) {
    %c0_i32 = arith.constant 0 : i32
    %c0_i32_0 = arith.constant 0 : i32
    %c0_i32_1 = arith.constant 0 : i32
    return %c0_i32, %c0_i32_0 : i32, i32
  }
  func.func @transform_5(%arg0: i32) -> (i32, i32) {
    %c0_i32 = arith.constant 0 : i32
    %c0_i32_0 = arith.constant 0 : i32
    return %arg0, %c0_i32 : i32, i32
  }
}

</mosaic_0001>

<bundles_post_ra>
// kernel: tpu_custom_call.1
= control target key start
LH: loop header
LB: loop body
LE: loop exit
PB: predicated region body
PF: predicated region fallthrough
CT: control target
= control target key end

     0   :  { %10 = vsyncpa [#allocation3], 0  ;;  %s874_s0 = inlined_call_operand.hbm [shape: f32[16,128], index: 0, kind: input, shape index: {}]   ;;  %s875_s1 = inlined_call_operand.hbm [shape: bf16[128,128], index: 1, kind: input, shape index: {}]   ;;  %s876_s2 = inlined_call_operand.hbm [shape: bf16[128,128], index: 2, kind: input, shape index: {}]   ;;  %s877_s3 = inlined_call_operand.hbm [shape: bf16[128,128], index: 3, kind: input, shape index: {}]   ;;  %s878_s4 = inlined_call_operand.vmem [shape: f32[3,128], index: 4, kind: input, shape index: {}]   ;;  %s879_s5 = inlined_call_operand.hbm [shape: f32[16,128], index: 5, kind: output, shape index: {}]  }
   0x1   :  { %11 = vsyncpa [#allocation6], 0 }
   0x2   :  { %12 = vsyncpa [#allocation9], 0 }
   0x3   :  { %13 = vsyncpa [#allocation4], 0  ;;  %s712_s18 = smov [#allocation5]   ;;  %s594_s22 = scalar_lea.hbm %s875_s1, 1024 }
   0x4   :  { %s31_s19 = sshll.u32 %s712_s18, 4  ;;  %p595_p0 = scmp.ne.s32.totalorder %s875_s1, %s594_s22  ;;  %s32_s19 = int_to_ptr.vmem [resolvable:$true] %s31_s19 }
   0x5   :  { %p598_p1 = scmp.lt.u32.totalorder %s594_s22, %s875_s1 }
   0x7   :  { %p600_p2 = pnand %p598_p1, %p595_p0 }
   0x9   :  { %603 = shalt.err (!%p600_p2)
}
   0xa   :  { %s604_s27 = scalar_lea.vmem %s32_s19, 1024  ;;  %p609_p4 = scmp.lt.s32.totalorder %s32_s19, %s32_s19 }
   0xb   :  { %p605_p3 = scmp.ne.s32.totalorder %s32_s19, %s604_s27  ;;  %p610_p5 = scmp.lt.s32.totalorder %s604_s27, %s604_s27 }
   0xd   :  { %p611_p6 = por %p610_p5, %p609_p4 }
   0xf   :  { %p612_p7 = pnand %p611_p6, %p605_p3 }
  0x11   :  { %615 = shalt.err (!%p612_p7)
}
  0x12   :  { %s713_s28 = smov 64   ;;  %s714_s29 = smov 4  }
  0x13   :  { %37 = dma.hbm_to_vmem [thread:$0]  %s875_s1, 1024, %s32_s19, [#allocation6], %s713_s28, %s713_s28, %s714_s29  }
  0x14   :  { %s715_s7 = smov [#allocation2]   ;;  %s616_s11 = scalar_lea.hbm %s874_s0, 256 }
  0x15   :  { %s19_s8 = sshll.u32 %s715_s7, 4  ;;  %p617_p8 = scmp.ne.s32.totalorder %s874_s0, %s616_s11  ;;  %s20_s8 = int_to_ptr.vmem [resolvable:$true] %s19_s8 }
  0x16   :  { %p620_p9 = scmp.lt.u32.totalorder %s616_s11, %s874_s0 }
  0x18   :  { %p622_p10 = pnand %p620_p9, %p617_p8 }
  0x1a   :  { %625 = shalt.err (!%p622_p10)
}
  0x1b   :  { %s626_s16 = scalar_lea.vmem %s20_s8, 256  ;;  %p631_p12 = scmp.lt.s32.totalorder %s20_s8, %s20_s8 }
  0x1c   :  { %p627_p11 = scmp.ne.s32.totalorder %s20_s8, %s626_s16  ;;  %p632_p13 = scmp.lt.s32.totalorder %s626_s16, %s626_s16 }
  0x1e   :  { %p633_p0 = por %p632_p13, %p631_p12 }
  0x20   :  { %p634_p1 = pnand %p633_p0, %p627_p11 }
  0x22   :  { %637 = shalt.err (!%p634_p1)
}
  0x23   :  { %s716_s1 = smov 128   ;;  %s717_s17 = smov 8  }
  0x24   :  { %25 = dma.hbm_to_vmem [thread:$0]  %s874_s0, 256, %s20_s8, [#allocation3], %s716_s1, %s716_s1, %s717_s17  }
  0x25   :  { %s718_s20 = smov [#allocation7]   ;;  %s719_s22 = smov [#allocation8]  }
  0x26   :  { %s43_s21 = sshll.u32 %s718_s20, 4  ;;  %s55_s23 = sshll.u32 %s719_s22, 4  ;;  %s44_s21 = int_to_ptr.vmem [resolvable:$true] %s43_s21  ;;  %s783_s23 = int_to_ptr.vmem [resolvable:$true] %s55_s23 }
  0x27   :  { %s638_s26 = scalar_lea.hbm %s876_s2, 1024 }
  0x28   :  { %p639_p2 = scmp.ne.s32.totalorder %s876_s2, %s638_s26  ;;  %p642_p3 = scmp.lt.u32.totalorder %s638_s26, %s876_s2 }
  0x2a   :  { %p644_p4 = pnand %p642_p3, %p639_p2 }
  0x2c   :  { %647 = shalt.err (!%p644_p4)
}
  0x2d   :  { %s648_s0 = scalar_lea.vmem %s44_s21, 1024  ;;  %p653_p6 = scmp.lt.s32.totalorder %s44_s21, %s44_s21 }
  0x2e   :  { %p649_p5 = scmp.ne.s32.totalorder %s44_s21, %s648_s0  ;;  %p654_p7 = scmp.lt.s32.totalorder %s648_s0, %s648_s0 }
  0x30   :  { %p655_p8 = por %p654_p7, %p653_p6 }
  0x32   :  { %p656_p9 = pnand %p655_p8, %p649_p5 }
  0x34   :  { %659 = shalt.err (!%p656_p9)
}
  0x35   :  { %49 = dma.hbm_to_vmem [thread:$0]  %s876_s2, 1024, %s44_s21, [#allocation6], %s713_s28, %s713_s28, %s714_s29  }
  0x36   :  { %s660_s12 = scalar_lea.hbm %s877_s3, 1024 }
  0x37   :  { %p661_p10 = scmp.ne.s32.totalorder %s877_s3, %s660_s12  ;;  %p664_p11 = scmp.lt.u32.totalorder %s660_s12, %s877_s3 }
  0x39   :  { %p666_p12 = pnand %p664_p11, %p661_p10 }
  0x3b   :  { %669 = shalt.err (!%p666_p12)
}
  0x3c   :  { %s670_s18 = scalar_lea.vmem %s783_s23, 1024  ;;  %p675_p0 = scmp.lt.s32.totalorder %s783_s23, %s783_s23 }
  0x3d   :  { %p671_p13 = scmp.ne.s32.totalorder %s783_s23, %s670_s18  ;;  %p676_p1 = scmp.lt.s32.totalorder %s670_s18, %s670_s18 }
  0x3f   :  { %p677_p2 = por %p676_p1, %p675_p0 }
  0x41   :  { %p678_p3 = pnand %p677_p2, %p671_p13 }
  0x43   :  { %681 = shalt.err (!%p678_p3)
}
  0x44   :  { %61 = dma.hbm_to_vmem [thread:$0]  %s877_s3, 1024, %s783_s23, [#allocation9], %s713_s28, %s713_s28, %s714_s29  }
  0x45   :  { %704 = dma.done.wait [#allocation3], 256  }
  0x46   :  { %705 = vsyncadd [#allocation3], 4294967040 }
  0x47   :  { %706 = dma.done.wait [#allocation6], 2048  }
  0x48   :  { %707 = vsyncadd [#allocation6], 4294965248 }
  0x49   :  { %708 = dma.done.wait [#allocation9], 1024  }
  0x4a   :  { %709 = vsyncadd [#allocation9], 4294966272  ;;  %v720_v0 = vmov 0.0   ;;  %vm721_vm0 = vmmov 0   ;;  %v570_v1 = vld [vmem:[#allocation5] sm:$0xff]   ;;  %v571_v2 = vld [vmem:[#allocation5 + $0x8] sm:$0xff]  }
  0x4b   :  { %499 = vmatprep.subr.bf16.mxu0 %v720_v0  ;;  %515 = vmatprep.mubr.msk.bf16.mxu0 %vm721_vm0, %v720_v0  ;;  %v572_v3 = vld [vmem:[#allocation5 + $0x10] sm:$0xff]   ;;  %v578_v4 = vld [vmem:[#allocation7] sm:$0xff]   ;;  %v573_v5 = vld [vmem:[#allocation5 + $0x18] sm:$0xff]   ;;  %s722_s23 = smov [#allocation10]  }
  0x4c   :  { %519 = vmatprep.subr.bf16.mxu1 %v720_v0  ;;  %535 = vmatprep.mubr.msk.bf16.mxu1 %vm721_vm0, %v720_v0  ;;  %v579_v6 = vld [vmem:[#allocation7 + $0x8] sm:$0xff]   ;;  %v574_v7 = vld [vmem:[#allocation5 + $0x20] sm:$0xff]   ;;  %v580_v8 = vld [vmem:[#allocation7 + $0x10] sm:$0xff]   ;;  %s431_s24 = sshll.u32 %s722_s23, 4  ;;  %s432_s24 = int_to_ptr.vmem [resolvable:$true] %s431_s24 }
  0x4d   :  { %500 = vmatpush3.bf16.msra.mxu0 %v570_v1  ;;  %520 = vmatpush3.bf16.msra.mxu1 %v578_v4  ;;  %v575_v9 = vld [vmem:[#allocation5 + $0x28] sm:$0xff]   ;;  %v581_v10 = vld [vmem:[#allocation7 + $0x18] sm:$0xff]   ;;  %v576_v11 = vld [vmem:[#allocation5 + $0x30] sm:$0xff]   ;;  %s682_s25 = scalar_lea.vmem %s432_s24, 256  ;;  %p687_p5 = scmp.lt.s32.totalorder %s432_s24, %s432_s24 }
  0x4e   :  { %501 = vmatprep.subr.bf16.mxu0 %v720_v0  ;;  %521 = vmatprep.subr.bf16.mxu1 %v720_v0  ;;  %v582_v12 = vld [vmem:[#allocation7 + $0x20] sm:$0xff]   ;;  %v577_v13 = vld [vmem:[#allocation5 + $0x38] sm:$0xff]   ;;  %v77_v14 = vld [vmem:[#allocation2] sm:$0xff]  ;;  %p683_p4 = scmp.ne.s32.totalorder %s432_s24, %s682_s25  ;;  %p688_p6 = scmp.lt.s32.totalorder %s682_s25, %s682_s25 }
  0x4f   :  { %v78_v15 = vld [vmem:[#allocation2 + $0x8] sm:$0xff]  ;;  %v583_v16 = vld [vmem:[#allocation7 + $0x28] sm:$0xff]   ;;  %v584_v18 = vld [vmem:[#allocation7 + $0x30] sm:$0xff]  }
  0x50   :  { %v96_v17 = vpack.c.bf16 %v78_v15, %v77_v14  ;;  %v585_v19 = vld [vmem:[#allocation7 + $0x38] sm:$0xff]   ;;  %v586_v20 = vld [vmem:[#allocation8] sm:$0xff]   ;;  %v587_v21 = vld [vmem:[#allocation8 + $0x8] sm:$0xff]   ;;  %p689_p7 = por %p688_p6, %p687_p5 }
  0x51   :  { %502 = vmatpush3.bf16.msra.mxu0 %v571_v2  ;;  %522 = vmatpush3.bf16.msra.mxu1 %v579_v6  ;;  %v588_v22 = vld [vmem:[#allocation8 + $0x10] sm:$0xff]   ;;  %v589_v23 = vld [vmem:[#allocation8 + $0x18] sm:$0xff]   ;;  %v590_v24 = vld [vmem:[#allocation8 + $0x20] sm:$0xff]  }
  0x52   :  { %503 = vmatprep.subr.bf16.mxu0 %v720_v0  ;;  %523 = vmatprep.subr.bf16.mxu1 %v720_v0  ;;  %v591_v25 = vld [vmem:[#allocation8 + $0x28] sm:$0xff]   ;;  %v445_v26 = vld [vmem:[%s878_s4] ss:$0 sm:$0xff]  ;;  %v593_v39 = vld [vmem:[#allocation8 + $0x38] sm:$0xff]   ;;  %p690_p8 = pnand %p689_p7, %p683_p4 }
  0x53   :  { %v592_v38 = vld [vmem:[#allocation8 + $0x30] sm:$0xff]  }
  0x54   :  { %v454_v40 = vld [vmem:[%s878_s4 + $0x1] ss:$0 sm:$0xff]  ;;  %v463_v52 = vld [vmem:[%s878_s4 + $0x2] ss:$0 sm:$0xff] }
  0x55   :  { %504 = vmatpush3.bf16.msra.mxu0 %v572_v3  ;;  %524 = vmatpush3.bf16.msra.mxu1 %v580_v8 }
  0x56   :  { %505 = vmatprep.subr.bf16.mxu0 %v720_v0  ;;  %525 = vmatprep.subr.bf16.mxu1 %v720_v0 }
  0x59   :  { %506 = vmatpush3.bf16.msra.mxu0 %v573_v5  ;;  %526 = vmatpush3.bf16.msra.mxu1 %v581_v10 }
  0x5a   :  { %507 = vmatprep.subr.bf16.mxu0 %v720_v0  ;;  %527 = vmatprep.subr.bf16.mxu1 %v720_v0 }
  0x5d   :  { %508 = vmatpush3.bf16.msra.mxu0 %v574_v7  ;;  %528 = vmatpush3.bf16.msra.mxu1 %v582_v12 }
  0x5e   :  { %509 = vmatprep.subr.bf16.mxu0 %v720_v0  ;;  %529 = vmatprep.subr.bf16.mxu1 %v720_v0 }
  0x61   :  { %510 = vmatpush3.bf16.msra.mxu0 %v575_v9  ;;  %530 = vmatpush3.bf16.msra.mxu1 %v583_v16 }
  0x62   :  { %511 = vmatprep.subr.bf16.mxu0 %v720_v0  ;;  %531 = vmatprep.subr.bf16.mxu1 %v720_v0 }
  0x65   :  { %512 = vmatpush3.bf16.msra.mxu0 %v576_v11  ;;  %532 = vmatpush3.bf16.msra.mxu1 %v584_v18 }
  0x66   :  { %513 = vmatprep.subr.bf16.mxu0 %v720_v0  ;;  %533 = vmatprep.subr.bf16.mxu1 %v720_v0 }
  0x69   :  { %514 = vmatpush3.bf16.msra.mxu0 %v577_v13  ;;  %534 = vmatpush3.bf16.msra.mxu1 %v585_v19 }
  0x6a   :  { %539 = vmatprep.subr.bf16.mxu0 %v720_v0 }
  0x6c   :  { %516 = vmatmul.mubr.bf16.vlgmr.msra.gmra.mrb[0].mxu0 %v96_v17 }
  0x6d   :  { %555 = vmatprep.mubr.msk.bf16.mxu0 %vm721_vm0, %v720_v0  ;;  %540 = vmatpush3.bf16.msra.mxu0 %v586_v20 }
  0x6e   :  { %541 = vmatprep.subr.bf16.mxu0 %v720_v0 }
  0x71   :  { %542 = vmatpush3.bf16.msra.mxu0 %v587_v21 }
  0x72   :  { %543 = vmatprep.subr.bf16.mxu0 %v720_v0 }
  0x75   :  { %544 = vmatpush3.bf16.msra.mxu0 %v588_v22 }
  0x76   :  { %545 = vmatprep.subr.bf16.mxu0 %v720_v0 }
  0x79   :  { %546 = vmatpush3.bf16.msra.mxu0 %v589_v23 }
  0x7a   :  { %547 = vmatprep.subr.bf16.mxu0 %v720_v0 }
  0x7d   :  { %548 = vmatpush3.bf16.msra.mxu0 %v590_v24 }
  0x7e   :  { %549 = vmatprep.subr.bf16.mxu0 %v720_v0 }
  0x81   :  { %550 = vmatpush3.bf16.msra.mxu0 %v591_v25 }
  0x82   :  { %551 = vmatprep.subr.bf16.mxu0 %v720_v0 }
  0x85   :  { %552 = vmatpush3.bf16.msra.mxu0 %v592_v38 }
  0x86   :  { %553 = vmatprep.subr.bf16.mxu0 %v720_v0 }
  0x89   :  { %554 = vmatpush3.bf16.msra.mxu0 %v593_v39 }
 0x13f   :  { %v183_v27 = vpop.f32.mrb[0].mxu0 }
 0x140   :  { %v184_v28 = vadd.f32 %v445_v26, %v183_v27  ;;  %v517_v29 = vpop.f32.mrb[1].mxu0 }
 0x141   :  { %v186_v30 = vpop.f32.mrb[2].mxu0 }
 0x142   :  { %v192_v31 = vmul.f32 0.1, %v184_v28  ;;  %v187_v32 = vadd.f32 %v445_v26, %v186_v30  ;;  %v518_v33 = vpop.f32.mrb[3].mxu0  ;;  %vm190_vm1 = vcmp.ge.f32.partialorder %v184_v28, 0.0 }
 0x144   :  { %vm191_vm2 = vcmp.ge.f32.partialorder %v187_v32, 0.0  ;;  %v193_v34 = vmul.f32 0.1, %v187_v32  ;;  %v194_v35 = vsel %vm190_vm1, %v184_v28, %v192_v31 }
 0x146   :  { %v195_v36 = vsel %vm191_vm2, %v187_v32, %v193_v34 }
 0x147   :  { %v213_v37 = vpack.c.bf16 %v195_v36, %v194_v35 }
 0x149   :  { %536 = vmatmul.mubr.bf16.vlgmr.msra.gmra.mrb[0].mxu1 %v213_v37 }
 0x21c   :  { %v300_v41 = vpop.f32.mrb[0].mxu1 }
 0x21d   :  { %v301_v42 = vadd.f32 %v454_v40, %v300_v41  ;;  %v537_v43 = vpop.f32.mrb[1].mxu1 }
 0x21e   :  { %v303_v44 = vpop.f32.mrb[2].mxu1 }
 0x21f   :  { %v309_v45 = vmul.f32 0.1, %v301_v42  ;;  %v304_v46 = vadd.f32 %v454_v40, %v303_v44  ;;  %v538_v47 = vpop.f32.mrb[3].mxu1  ;;  %vm307_vm3 = vcmp.ge.f32.partialorder %v301_v42, 0.0 }
 0x221   :  { %vm308_vm4 = vcmp.ge.f32.partialorder %v304_v46, 0.0  ;;  %v310_v48 = vmul.f32 0.1, %v304_v46  ;;  %v311_v49 = vsel %vm307_vm3, %v301_v42, %v309_v45 }
 0x223   :  { %v312_v50 = vsel %vm308_vm4, %v304_v46, %v310_v48 }
 0x224   :  { %v330_v51 = vpack.c.bf16 %v312_v50, %v311_v49 }
 0x226   :  { %556 = vmatmul.mubr.bf16.vlgmr.msra.gmra.mrb[4].mxu0 %v330_v51 }
 0x2f9   :  { %v417_v53 = vpop.f32.mrb[4].mxu0 }
 0x2fa   :  { %v418_v54 = vadd.f32 %v463_v52, %v417_v53  ;;  %v557_v55 = vpop.f32.mrb[5].mxu0 }
 0x2fb   :  { %v420_v56 = vpop.f32.mrb[6].mxu0 }
 0x2fc   :  { %424 = vst [vmem:[#allocation10] sm:$0xff] %v418_v54  ;;  %v421_v57 = vadd.f32 %v463_v52, %v420_v56  ;;  %v558_v58 = vpop.f32.mrb[7].mxu0 }
 0x2fe   :  { %425 = vst [vmem:[#allocation10 + $0x8] sm:$0xff] %v421_v57 }
 0x2ff   :  { %693 = shalt.err (!%p690_p8)
}
 0x300   :  { %s694_s27 = scalar_lea.hbm %s879_s5, 256 }
 0x301   :  { %p695_p9 = scmp.ne.s32.totalorder %s879_s5, %s694_s27  ;;  %p698_p10 = scmp.lt.u32.totalorder %s694_s27, %s879_s5 }
 0x303   :  { %p700_p11 = pnand %p698_p10, %p695_p9 }
 0x305   :  { %703 = shalt.err (!%p700_p11)
}
 0x306   :  { %437 = dma.vmem_to_hbm [thread:$0]  %s432_s24, 256, %s879_s5, [#allocation4], %s716_s1, %s716_s1, %s717_s17  }
 0x307   :  { %710 = dma.done.wait [#allocation4], 256  }
 0x308   :  { %711 = vsyncadd [#allocation4], 4294967040 }
 0x309   :  { %441 = vsyncpa [#allocation3], 1 }
 0x30a   :  { %442 = vsyncpa [#allocation6], 1 }
 0x30b   :  { %443 = vsyncpa [#allocation9], 1 }
 0x30c   :  { %444 = vsyncpa [#allocation4], 1 }

</bundles_post_ra>
